<compile_context>
chip_gen: v5e
topology: v5e:2x2
jax: 0.10.0
libtpu: 0.0.40
codegen_flags: <defaults>
</compile_context>

<pallas_src>
import functools

import jax
import jax.numpy as jnp
from jax.experimental import pallas as pl
from jax.experimental.pallas import tpu as pltpu


def _mlp_kernel(x_ref, w1_ref, b1_ref, w2_ref, b2_ref, o_ref, acc_ref):
    """One (token-tile, hidden-slab) step of o = gelu(x @ W1 + b1) @ W2 + b2."""
    hk = pl.program_id(1)

    @pl.when(hk == 0)
    def _init():
        acc_ref[...] = jnp.zeros_like(acc_ref)

    # First matmul on the MXU, f32 accumulation regardless of input dtype.
    h = jnp.dot(x_ref[...], w1_ref[...], preferred_element_type=jnp.float32)
    h = h + b1_ref[...]                                   # (1, bh) broadcast, f32

    # Exact GELU (matches torch.nn.GELU(approximate='none')).
    inv_sqrt2 = jnp.float32(0.7071067811865476)
    h = 0.5 * h * (1.0 + jax.lax.erf(h * inv_sqrt2))

    # Second matmul: accumulate this hidden slab's contribution.
    acc_ref[...] += jnp.dot(h.astype(w2_ref.dtype), w2_ref[...],
                            preferred_element_type=jnp.float32)

    @pl.when(hk == pl.num_programs(1) - 1)
    def _finalize():
        o_ref[...] = (acc_ref[...] + b2_ref[...]).astype(o_ref.dtype)


@functools.partial(jax.jit, static_argnames=("block_m", "block_h", "use_bf16"))
def transformer_mlp(x, w1, b1, w2, b2, *, block_m=256, block_h=512,
                    use_bf16=False):
    """Applies Linear(dim->hidden) -> GELU -> Linear(hidden->dim) to last axis.

    x:  (..., dim)
    w1: (dim, hidden), b1: (hidden,)
    w2: (hidden, dim), b2: (dim,)
    block_m / block_h: token-tile / hidden-slab sizes (sweep 256/512/1024).
    use_bf16: run the MXU matmuls in bf16 (f32 accumulation) — recommended on
              v6e/v7x when bit-exactness vs an f32 reference is not required.
    """
    orig_shape = x.shape
    dim = orig_shape[-1]
    hidden = w1.shape[1]
    out_dtype = x.dtype

    x2d = x.reshape(-1, dim)
    m = x2d.shape[0]

    # Only pad tokens up to the 8-sublane boundary; the (possibly partial) last
    # M tile is handled by a cdiv grid, so no full block_m pad copy is made.
    m_pad = ((m + 7) // 8) * 8
    if m_pad != m:
        x2d = jnp.pad(x2d, ((0, m_pad - m), (0, 0)))

    # Effective tile sizes (static Python ints).
    bm = min(block_m, m_pad)
    bm = max(8, (bm // 8) * 8)                 # keep a multiple of 8 sublanes
    if hidden % block_h == 0:
        bh = block_h                           # hidden evenly tiled
    else:
        bh = hidden                            # reduction axis must divide evenly

    compute_dtype = jnp.bfloat16 if use_bf16 else x2d.dtype
    xk = x2d.astype(compute_dtype)
    w1k = w1.astype(compute_dtype)
    w2k = w2.astype(compute_dtype)
    b1_2d = b1.reshape(1, hidden).astype(jnp.float32)
    b2_2d = b2.reshape(1, dim).astype(jnp.float32)

    grid = (pl.cdiv(m_pad, bm), hidden // bh)

    itemsize = jnp.dtype(compute_dtype).itemsize
    cost = pl.CostEstimate(
        flops=4 * m_pad * dim * hidden,                  # two matmuls
        transcendentals=m_pad * hidden,                  # one erf per hidden act
        bytes_accessed=(m_pad * dim * itemsize           # x
                        + dim * hidden * itemsize        # W1
                        + hidden * dim * itemsize        # W2
                        + (hidden + dim) * 4             # biases (f32)
                        + m_pad * dim * jnp.dtype(out_dtype).itemsize),  # out
    )

    out = pl.pallas_call(
        _mlp_kernel,
        out_shape=jax.ShapeDtypeStruct((m_pad, dim), out_dtype),
        grid_spec=pltpu.PrefetchScalarGridSpec(
            num_scalar_prefetch=0,
            grid=grid,
            in_specs=[
                pl.BlockSpec((bm, dim), lambda i, hk: (i, 0)),    # x tile
                pl.BlockSpec((dim, bh), lambda i, hk: (0, hk)),   # W1 col slab
                pl.BlockSpec((1, bh), lambda i, hk: (0, hk)),     # b1 slab
                pl.BlockSpec((bh, dim), lambda i, hk: (hk, 0)),   # W2 row slab
                pl.BlockSpec((1, dim), lambda i, hk: (0, 0)),     # b2 (resident)
            ],
            out_specs=pl.BlockSpec((bm, dim), lambda i, hk: (i, 0)),
            scratch_shapes=[pltpu.VMEM((bm, dim), jnp.float32)],  # accumulator
        ),
        compiler_params=pltpu.CompilerParams(
            dimension_semantics=("parallel", "arbitrary"),
        ),
        cost_estimate=cost,
    )(xk, w1k, b1_2d, w2k, b2_2d)

    out = out[:m]
    return out.reshape(orig_shape)


def _reference_mlp(x, w1, b1, w2, b2):
    h = x @ w1 + b1
    h = 0.5 * h * (1.0 + jax.lax.erf(h * jnp.float32(0.7071067811865476)))
    return h @ w2 + b2


def init_params(key, dim, hidden_dim):
    """Deterministic parameter init (uniform like torch.nn.Linear defaults)."""
    k1, k2, k3, k4 = jax.random.split(key, 4)
    bound1 = 1.0 / (dim ** 0.5)
    bound2 = 1.0 / (hidden_dim ** 0.5)
    w1 = jax.random.uniform(k1, (dim, hidden_dim), jnp.float32, -bound1, bound1)
    b1 = jax.random.uniform(k2, (hidden_dim,), jnp.float32, -bound1, bound1)
    w2 = jax.random.uniform(k3, (hidden_dim, dim), jnp.float32, -bound2, bound2)
    b2 = jax.random.uniform(k4, (dim,), jnp.float32, -bound2, bound2)
    return w1, b1, w2, b2


if __name__ == "__main__":
    batch, seq, dim, hidden_dim = 2, 8, 32, 64

    key = jax.random.PRNGKey(0)
    kx, kp = jax.random.split(key)
    x = jax.random.normal(kx, (batch, seq, dim), dtype=jnp.float32)
    w1, b1, w2, b2 = init_params(kp, dim, hidden_dim)

    ref = _reference_mlp(x.reshape(-1, dim), w1, b1, w2, b2).reshape(x.shape)

    # f32 path: bit-for-bit semantics of the PyTorch module (exact erf GELU).
    out = jax.block_until_ready(transformer_mlp(x, w1, b1, w2, b2))
    assert out.shape == x.shape
    assert jnp.allclose(out, ref, atol=1e-5, rtol=1e-5), "f32 mismatch vs reference"

    # bf16 MXU path (v6e/v7x perf recommendation): looser tolerance expected.
    out_bf16 = jax.block_until_ready(
        transformer_mlp(x, w1, b1, w2, b2, use_bf16=True))
    assert jnp.allclose(out_bf16, ref, atol=5e-2, rtol=5e-2), "bf16 mismatch"

    print("KERNEL_OK")
</pallas_src>

<mosaic_0001>
module attributes {stable_mosaic.version = 11 : i64} {
  func.func @_mlp_kernel(%arg0: i32, %arg1: i32, %arg2: memref<16x32xf32, #tpu.memory_space<vmem>>, %arg3: memref<32x64xf32, #tpu.memory_space<vmem>>, %arg4: memref<1x64xf32, #tpu.memory_space<vmem>>, %arg5: memref<64x32xf32, #tpu.memory_space<vmem>>, %arg6: memref<1x32xf32, #tpu.memory_space<vmem>>, %arg7: memref<16x32xf32, #tpu.memory_space<vmem>>, %arg8: memref<16x32xf32, #tpu.memory_space<vmem>>) attributes {dimension_semantics = [#tpu.dimension_semantics<parallel>, #tpu.dimension_semantics<arbitrary>], iteration_bounds = array<i64: 1, 1>, scalar_prefetch = 0 : i64, scratch_operands = 1 : i64, tpu.core_type = #tpu.core_type<tc>, window_params = [{transform_indices = @transform_0, window_bounds = array<i64: 16, 32>}, {transform_indices = @transform_1, window_bounds = array<i64: 32, 64>}, {transform_indices = @transform_2, window_bounds = array<i64: 1, 64>}, {transform_indices = @transform_3, window_bounds = array<i64: 64, 32>}, {pipeline_mode = #tpu.pipeline_mode<synchronous>, transform_indices = @transform_4, window_bounds = array<i64: 1, 32>}, {transform_indices = @transform_5, window_bounds = array<i64: 16, 32>}]} {
    %c0_i32 = arith.constant 0 : i32
    %0 = arith.cmpi eq, %arg1, %c0_i32 : i32
    %1 = arith.extui %0 : i1 to i32
    %c0_i32_0 = arith.constant 0 : i32
    %2 = arith.cmpi ne, %1, %c0_i32_0 : i32
    scf.if %2 {
      %cst_18 = arith.constant 0.000000e+00 : f32
      %25 = vector.broadcast %cst_18 : f32 to vector<16x32xf32>
      %c0_19 = arith.constant 0 : index
      %c0_20 = arith.constant 0 : index
      %26 = vector.load %arg8[%c0_19, %c0_20] : memref<16x32xf32, #tpu.memory_space<vmem>>, vector<16x32xf32>
      tpu.vector_store %arg8[%c0_19, %c0_20], %25 {strides = array<i32>} : memref<16x32xf32, #tpu.memory_space<vmem>>, vector<16x32xf32>,
    } else {
    }
    %c0 = arith.constant 0 : index
    %c0_1 = arith.constant 0 : index
    %3 = vector.load %arg2[%c0, %c0_1] : memref<16x32xf32, #tpu.memory_space<vmem>>, vector<16x32xf32>
    %c0_2 = arith.constant 0 : index
    %c0_3 = arith.constant 0 : index
    %4 = vector.load %arg3[%c0_2, %c0_3] : memref<32x64xf32, #tpu.memory_space<vmem>>, vector<32x64xf32>
    %cst = arith.constant dense<0.000000e+00> : vector<16x64xf32>
    %5 = tpu.matmul %3, %4, %cst {dimension_numbers = #tpu.dot_dimension_numbers<[1], [0], [0], [1], [0, 0, 1, 1], [], []>} : vector<16x32xf32>, vector<32x64xf32>, vector<16x64xf32> -> vector<16x64xf32>
    %c0_4 = arith.constant 0 : index
    %c0_5 = arith.constant 0 : index
    %6 = vector.load %arg4[%c0_4, %c0_5] : memref<1x64xf32, #tpu.memory_space<vmem>>, vector<1x64xf32>
    %7 = vector.broadcast %6 : vector<1x64xf32> to vector<16x64xf32>
    %8 = arith.addf %5, %7 : vector<16x64xf32>
    %cst_6 = arith.constant 5.000000e-01 : f32
    %9 = vector.broadcast %cst_6 : f32 to vector<16x64xf32>
    %10 = arith.mulf %9, %8 : vector<16x64xf32>
    %cst_7 = arith.constant 0.707106769 : f32
    %11 = vector.broadcast %cst_7 : f32 to vector<16x64xf32>
    %12 = arith.mulf %8, %11 : vector<16x64xf32>
    %13 = math.erf %12 : vector<16x64xf32>
    %cst_8 = arith.constant 1.000000e+00 : f32
    %14 = vector.broadcast %cst_8 : f32 to vector<16x64xf32>
    %15 = arith.addf %14, %13 : vector<16x64xf32>
    %16 = arith.mulf %10, %15 : vector<16x64xf32>
    %c0_9 = arith.constant 0 : index
    %c0_10 = arith.constant 0 : index
    %17 = vector.load %arg8[%c0_9, %c0_10] : memref<16x32xf32, #tpu.memory_space<vmem>>, vector<16x32xf32>
    %c0_11 = arith.constant 0 : index
    %c0_12 = arith.constant 0 : index
    %18 = vector.load %arg5[%c0_11, %c0_12] : memref<64x32xf32, #tpu.memory_space<vmem>>, vector<64x32xf32>
    %cst_13 = arith.constant dense<0.000000e+00> : vector<16x32xf32>
    %19 = tpu.matmul %16, %18, %cst_13 {dimension_numbers = #tpu.dot_dimension_numbers<[1], [0], [0], [1], [0, 0, 1, 1], [], []>} : vector<16x64xf32>, vector<64x32xf32>, vector<16x32xf32> -> vector<16x32xf32>
    %20 = arith.addf %17, %19 : vector<16x32xf32>
    %c0_14 = arith.constant 0 : index
    %c0_15 = arith.constant 0 : index
    %21 = vector.load %arg8[%c0_14, %c0_15] : memref<16x32xf32, #tpu.memory_space<vmem>>, vector<16x32xf32>
    tpu.vector_store %arg8[%c0_14, %c0_15], %20 {strides = array<i32>} : memref<16x32xf32, #tpu.memory_space<vmem>>, vector<16x32xf32>,
    %c0_i32_16 = arith.constant 0 : i32
    %22 = arith.cmpi eq, %arg1, %c0_i32_16 : i32
    %23 = arith.extui %22 : i1 to i32
    %c0_i32_17 = arith.constant 0 : i32
    %24 = arith.cmpi ne, %23, %c0_i32_17 : i32
    scf.if %24 {
      %c0_18 = arith.constant 0 : index
      %c0_19 = arith.constant 0 : index
      %25 = vector.load %arg8[%c0_18, %c0_19] : memref<16x32xf32, #tpu.memory_space<vmem>>, vector<16x32xf32>
      %c0_20 = arith.constant 0 : index
      %c0_21 = arith.constant 0 : index
      %26 = vector.load %arg6[%c0_20, %c0_21] : memref<1x32xf32, #tpu.memory_space<vmem>>, vector<1x32xf32>
      %27 = vector.broadcast %26 : vector<1x32xf32> to vector<16x32xf32>
      %28 = arith.addf %25, %27 : vector<16x32xf32>
      %c0_22 = arith.constant 0 : index
      %c0_23 = arith.constant 0 : index
      %29 = vector.load %arg7[%c0_22, %c0_23] : memref<16x32xf32, #tpu.memory_space<vmem>>, vector<16x32xf32>
      tpu.vector_store %arg7[%c0_22, %c0_23], %28 {strides = array<i32>} : memref<16x32xf32, #tpu.memory_space<vmem>>, vector<16x32xf32>,
    } else {
    }
    return
  }
  func.func @transform_0(%arg0: i32, %arg1: i32) -> (i32, i32) {
    %c0_i32 = arith.constant 0 : i32
    %c0_i32_0 = arith.constant 0 : i32
    return %arg0, %c0_i32 : i32, i32
  }
  func.func @transform_1(%arg0: i32, %arg1: i32) -> (i32, i32) {
    %c0_i32 = arith.constant 0 : i32
    %c0_i32_0 = arith.constant 0 : i32
    return %c0_i32, %arg1 : i32, i32
  }
  func.func @transform_2(%arg0: i32, %arg1: i32) -> (i32, i32) {
    %c0_i32 = arith.constant 0 : i32
    %c0_i32_0 = arith.constant 0 : i32
    return %c0_i32, %arg1 : i32, i32
  }
  func.func @transform_3(%arg0: i32, %arg1: i32) -> (i32, i32) {
    %c0_i32 = arith.constant 0 : i32
    %c0_i32_0 = arith.constant 0 : i32
    return %arg1, %c0_i32 : i32, i32
  }
  func.func @transform_4(%arg0: i32, %arg1: i32) -> (i32, i32) {
    %c0_i32 = arith.constant 0 : i32
    %c0_i32_0 = arith.constant 0 : i32
    %c0_i32_1 = arith.constant 0 : i32
    return %c0_i32, %c0_i32_0 : i32, i32
  }
  func.func @transform_5(%arg0: i32, %arg1: i32) -> (i32, i32) {
    %c0_i32 = arith.constant 0 : i32
    %c0_i32_0 = arith.constant 0 : i32
    return %arg0, %c0_i32 : i32, i32
  }
}

</mosaic_0001>

<bundles_post_ra>
// kernel: transformer_mlp.1
= control target key start
LH: loop header
LB: loop body
LE: loop exit
PB: predicated region body
PF: predicated region fallthrough
CT: control target
= control target key end

     0   :  { %s420_s0 = inlined_call_operand.vmem [shape: f32[16,32], index: 0, kind: input, shape index: {}]   ;;  %s421_s1 = inlined_call_operand.vmem [shape: f32[32,64], index: 1, kind: input, shape index: {}]   ;;  %s422_s2 = inlined_call_operand.vmem [shape: f32[1,64], index: 2, kind: input, shape index: {}]   ;;  %s423_s3 = inlined_call_operand.vmem [shape: f32[64,32], index: 3, kind: input, shape index: {}]   ;;  %s424_s4 = inlined_call_operand.vmem [shape: f32[1,32], index: 4, kind: input, shape index: {}]   ;;  %s425_s5 = inlined_call_operand.hbm [shape: f32[16,32], index: 5, kind: output, shape index: {}]  }
   0x1   :  { %v33_v0 = vld [vmem:[%s421_s1 + $0x18] sm:$0xff]  ;;  %v32_v1 = vld [vmem:[%s421_s1 + $0x10] sm:$0xff]  ;;  %v31_v2 = vld [vmem:[%s421_s1 + $0x8] sm:$0xff] }
   0x2   :  { %57 = vmatpush.msra.mxu0 %v33_v0  ;;  %237 = vmatpush.msra.mxu3 %v33_v0 }
   0x3   :  { %10 = vsyncpa [#allocation4], 0  ;;  %v30_v3 = vld [vmem:[%s421_s1] sm:$0xff]  ;;  %vm25_vm0 = vcmask 261120   ;;  %v29_v5 = vld [vmem:[%s420_s0 + $0x8] sm:$0xff]  ;;  %v285_v56 = vmov 0.0  }
   0x4   :  { %58 = vmatpush.msra.mxu0 %v32_v1  ;;  %238 = vmatpush.msra.mxu3 %v32_v1  ;;  %v28_v4 = vld [vmem:[%s420_s0] sm:$0xff]  ;;  %v165_v14 = vld [vmem:[%s423_s3 + $0x38] sm:$0xff]  ;;  %v164_v18 = vld [vmem:[%s423_s3 + $0x30] sm:$0xff]  ;;  %26 = vst.msk [vmem:[#allocation2] sm:$0xff] %vm25_vm0, %v285_v56  ;;  %vm166_vm9 = vcmask 523264   ;;  %s286_s21 = smov [#allocation3]  }
   0x5   :  { %v253_v6 = vld [vmem:[%s422_s2] ss:$0 sm:$0xff]  ;;  %181 = vmatpush.msra.mxu1 %v165_v14  ;;  %241 = vmatpush.msra.mxu2 %v165_v14  ;;  %v163_v22 = vld [vmem:[%s423_s3 + $0x28] sm:$0xff]  ;;  %v161_v31 = vld [vmem:[%s423_s3 + $0x18] sm:$0xff]  ;;  %27 = vst.msk [vmem:[#allocation2 + $0x8] sm:$0xff] %vm25_vm0, %v285_v56  ;;  %s217_s22 = sshll.u32 %s286_s21, 4  ;;  %s218_s22 = int_to_ptr.vmem [resolvable:$true] %s217_s22 }
   0x6   :  { %59 = vmatpush.msra.mxu0 %v31_v2  ;;  %239 = vmatpush.msra.mxu3 %v31_v2  ;;  %v162_v26 = vld [vmem:[%s423_s3 + $0x20] sm:$0xff]  ;;  %v160_v35 = vld [vmem:[%s423_s3 + $0x10] sm:$0xff]  ;;  %v159_v40 = vld [vmem:[%s423_s3 + $0x8] sm:$0xff]  ;;  %s219_s25 = sshll.u32 %s425_s5, 4  ;;  %s288_s26 = smov 8   ;;  %s220_s25 = int_to_ptr.hbm [resolvable:$true] %s219_s25 }
   0x7   :  { %182 = vmatpush.msra.mxu1 %v164_v18  ;;  %242 = vmatpush.msra.mxu2 %v164_v18  ;;  %v158_v42 = vld [vmem:[%s423_s3] sm:$0xff] }
   0x8   :  { %60 = vmatpush.msra.mxu0 %v30_v3  ;;  %240 = vmatpush.msra.mxu3 %v30_v3 }
   0x9   :  { %231 = vmatmul.msk.f32.vlgmr.msra.gmra.mxu0 %vm25_vm0, %v28_v4  ;;  %232 = vmatmul.msk.f32.vlgmr.msra.gmra.mxu3 %vm25_vm0, %v29_v5 }
   0xa   :  { %183 = vmatpush.msra.mxu1 %v163_v22  ;;  %243 = vmatpush.msra.mxu2 %v163_v22 }
   0xc   :  { %184 = vmatpush.msra.mxu1 %v162_v26  ;;  %244 = vmatpush.msra.mxu2 %v162_v26 }
   0xe   :  { %185 = vmatpush.msra.mxu1 %v161_v31  ;;  %245 = vmatpush.msra.mxu2 %v161_v31 }
  0x10   :  { %186 = vmatpush.msra.mxu1 %v160_v35  ;;  %246 = vmatpush.msra.mxu2 %v160_v35 }
  0x12   :  { %187 = vmatpush.msra.mxu1 %v159_v40  ;;  %247 = vmatpush.msra.mxu2 %v159_v40  ;;  %v157_v40 = vld [vmem:[#allocation2 + $0x8] sm:$0xff] }
  0x14   :  { %188 = vmatpush.msra.mxu1 %v158_v42  ;;  %248 = vmatpush.msra.mxu2 %v158_v42 }
  0x86   :  { %v62_v7 = vpop.f32.mrf.mxu0 }
  0x87   :  { %v342_v8 = vadd.f32 %v253_v6, %v62_v7 }
  0x89   :  { %v345_v9 = vmul.f32 0.70710677, %v342_v8 }
  0x8b   :  { %v72_v10 = vmul.f32 %v345_v9, %v345_v9 }
  0x8c   :  { %v65_v11 = vpop.f32.mrf.mxu3 }
  0x8d   :  { %v349_v12 = vmin.f32 %v72_v10, 16.0  ;;  %v351_v13 = vadd.f32 %v253_v6, %v65_v11 }
  0x8f   :  { %v74_v15 = vmul.f32 2.1237322e-06, %v349_v12  ;;  %v85_v16 = vmul.f32 3.8918573e-05, %v349_v12  ;;  %v359_v17 = vmul.f32 0.70710677, %v351_v13 }
  0x91   :  { %v75_v19 = vadd.f32 0.00028619796, %v74_v15  ;;  %v86_v20 = vadd.f32 0.001143296, %v85_v16  ;;  %v112_v21 = vmul.f32 %v359_v17, %v359_v17 }
  0x93   :  { %v76_v23 = vmul.f32 %v75_v19, %v349_v12  ;;  %v87_v24 = vmul.f32 %v86_v20, %v349_v12  ;;  %v371_v25 = vmin.f32 %v112_v21, 16.0 }
  0x95   :  { %v77_v27 = vadd.f32 0.0036580483, %v76_v23  ;;  %v88_v28 = vadd.f32 0.014752088, %v87_v24  ;;  %v114_v29 = vmul.f32 2.1237322e-06, %v371_v25 }
  0x96   :  { %v125_v30 = vmul.f32 3.8918573e-05, %v371_v25 }
  0x97   :  { %v89_v32 = vmul.f32 %v88_v28, %v349_v12  ;;  %v115_v33 = vadd.f32 0.00028619796, %v114_v29  ;;  %v78_v37 = vmul.f32 %v77_v27, %v349_v12  ;;  %v68_v27 = vmul.f32 0.5, %v342_v8 }
  0x98   :  { %v126_v34 = vadd.f32 0.001143296, %v125_v30 }
  0x99   :  { %v90_v36 = vadd.f32 0.112945676, %v89_v32  ;;  %v116_v38 = vmul.f32 %v115_v33, %v371_v25  ;;  %v79_v46 = vadd.f32 0.05243302, %v78_v37  ;;  %v156_v37 = vld [vmem:[#allocation2] sm:$0xff] }
  0x9a   :  { %v127_v39 = vmul.f32 %v126_v34, %v371_v25  ;;  %v69_v34 = vmul.f32 0.5, %v351_v13 }
  0x9b   :  { %v91_v41 = vmul.f32 %v90_v36, %v349_v12  ;;  %v117_v45 = vadd.f32 0.0036580483, %v116_v38  ;;  %v80_v52 = vmul.f32 %v79_v46, %v349_v12 }
  0x9c   :  { %v128_v43 = vadd.f32 0.014752088, %v127_v39 }
  0x9d   :  { %v92_v44 = vadd.f32 0.4994258, %v91_v41  ;;  %v118_v51 = vmul.f32 %v117_v45, %v371_v25  ;;  %v81_v57 = vadd.f32 0.18741608, %v80_v52 }
  0x9e   :  { %v129_v47 = vmul.f32 %v128_v43, %v371_v25 }
  0x9f   :  { %v93_v48 = vmul.f32 %v92_v44, %v349_v12  ;;  %v119_v55 = vadd.f32 0.05243302, %v118_v51  ;;  %v82_v62 = vmul.f32 %v81_v57, %v349_v12 }
  0xa0   :  { %v130_v49 = vadd.f32 0.112945676, %v129_v47 }
  0xa1   :  { %v94_v50 = vadd.f32 1.0, %v93_v48  ;;  %v120_v61 = vmul.f32 %v119_v55, %v371_v25  ;;  %v83_v3 = vadd.f32 1.1283791, %v82_v62 }
  0xa2   :  { %v131_v53 = vmul.f32 %v130_v49, %v371_v25 }
  0xa3   :  { %255 = vrcp.f32 %v94_v50  ;;  %v106_v1 = vand.u32 2147483648, %v94_v50  ;;  %v121_v2 = vadd.f32 0.18741608, %v120_v61  ;;  %v104_v5 = vand.u32 2147483647, %v94_v50 }
  0xa4   :  { %v132_v54 = vadd.f32 0.4994258, %v131_v53  ;;  %vm100_vm2 = vweird.f32 %v94_v50  ;;  %v84_v15 = vmul.f32 %v83_v3, %v345_v9 }
  0xa5   :  { %v107_v10 = vor.u32 1.1754944e-38, %v106_v1  ;;  %v122_v11 = vmul.f32 %v121_v2, %v371_v25  ;;  %vm105_vm4 = vcmp.eq.f32.partialorder %v104_v5, 8.507059e+37 }
  0xa6   :  { %v133_v58 = vmul.f32 %v132_v54, %v371_v25 }
  0xa7   :  { %v123_v21 = vadd.f32 1.1283791, %v122_v11 }
  0xa8   :  { %v134_v59 = vadd.f32 1.0, %v133_v58 }
  0xa9   :  { %v256_v60 = vpop.eup %255  ;;  %v124_v9 = vmul.f32 %v123_v21, %v359_v17  ;;  %v254_v17 = vld [vmem:[%s424_s4] ss:$0 sm:$0xff]  ;;  %s287_s4 = smov 128  }
  0xaa   :  { %v96_v63 = vmul.f32 %v256_v60, %v94_v50  ;;  %257 = vrcp.f32 %v134_v59  ;;  %vm101_vm1 = vweird.f32 %v256_v60  ;;  %v146_v20 = vand.u32 2147483648, %v134_v59 }
  0xab   :  { %vm102_vm3 = vmor %vm100_vm2, %vm101_vm1  ;;  %v144_v23 = vand.u32 2147483647, %v134_v59  ;;  %vm140_vm6 = vweird.f32 %v134_v59 }
  0xac   :  { %v97_v0 = vsub.f32 1.0, %v96_v63  ;;  %v147_v25 = vor.u32 1.1754944e-38, %v146_v20 }
  0xad   :  { %vm145_vm8 = vcmp.eq.f32.partialorder %v144_v23, 8.507059e+37 }
  0xae   :  { %v98_v4 = vmul.f32 %v256_v60, %v97_v0 }
  0xb0   :  { %v258_v6 = vpop.eup %257  ;;  %v99_v7 = vadd.f32 %v256_v60, %v98_v4 }
  0xb1   :  { %v136_v14 = vmul.f32 %v258_v6, %v134_v59  ;;  %vm141_vm5 = vweird.f32 %v258_v6 }
  0xb2   :  { %v103_v12 = vsel %vm102_vm3, %v256_v60, %v99_v7  ;;  %vm142_vm7 = vmor %vm140_vm6, %vm141_vm5 }
  0xb3   :  { %v108_v16 = vsel %vm105_vm4, %v107_v10, %v103_v12  ;;  %v137_v18 = vsub.f32 1.0, %v136_v14 }
  0xb4   :  { %v109_v19 = vmul.f32 %v108_v16, %v84_v15 }
  0xb5   :  { %v138_v22 = vmul.f32 %v258_v6, %v137_v18 }
  0xb6   :  { %v233_v24 = vclamps-f32 %v109_v19, 1.0 }
  0xb7   :  { %v139_v26 = vadd.f32 %v258_v6, %v138_v22 }
  0xb8   :  { %v152_v28 = vadd.f32 1.0, %v233_v24 }
  0xb9   :  { %v143_v29 = vsel %vm142_vm7, %v258_v6, %v139_v26 }
  0xba   :  { %v148_v30 = vsel %vm145_vm8, %v147_v25, %v143_v29  ;;  %v154_v31 = vmul.f32 %v152_v28, %v68_v27 }
  0xbb   :  { %v149_v32 = vmul.f32 %v148_v30, %v124_v9 }
  0xbc   :  { %235 = vmatmul.msk.f32.vlgmr.msra.gmra.mxu1 %vm166_vm9, %v154_v31 }
  0xbd   :  { %v234_v33 = vclamps-f32 %v149_v32, 1.0 }
  0xbf   :  { %v153_v35 = vadd.f32 1.0, %v234_v33 }
  0xc1   :  { %v155_v36 = vmul.f32 %v153_v35, %v69_v34 }
  0xc3   :  { %236 = vmatmul.msk.f32.vlgmr.msra.gmra.mxu2 %vm166_vm9, %v155_v36 }
 0x139   :  { %v190_v8 = vpop.f32.mrf.mxu1 }
 0x13a   :  { %v196_v38 = vadd.f32 %v190_v8, %v156_v37 }
 0x13c   :  { %198 = vst.msk [vmem:[#allocation2] sm:$0xff] %vm25_vm0, %v196_v38 }
 0x143   :  { %v203_v39 = vld [vmem:[#allocation2] sm:$0xff] }
 0x144   :  { %v209_v41 = vadd.f32 %v254_v17, %v203_v39 }
 0x146   :  { %v193_v42 = vpop.f32.mrf.mxu2  ;;  %211 = vst.msk [vmem:[#allocation3] sm:$0xff] %vm25_vm0, %v209_v41 }
 0x147   :  { %v197_v43 = vadd.f32 %v193_v42, %v157_v40 }
 0x149   :  { %199 = vst.msk [vmem:[#allocation2 + $0x8] sm:$0xff] %vm25_vm0, %v197_v43 }
 0x150   :  { %v204_v13 = vld [vmem:[#allocation2 + $0x8] sm:$0xff] }
 0x151   :  { %v210_v44 = vadd.f32 %v254_v17, %v204_v13 }
 0x153   :  { %212 = vst.msk [vmem:[#allocation3 + $0x8] sm:$0xff] %vm25_vm0, %v210_v44 }
 0x154   :  { %225 = dma.vmem_to_hbm [thread:$0]  %s218_s22, 256, %s220_s25, [#allocation4], %s287_s4, %s287_s4, %s288_s26  }
 0x155   :  { %283 = dma.done.wait [#allocation4], 256  }
 0x156   :  { %284 = vsyncadd [#allocation4], 4294967040 }
 0x157   :  { %230 = vsyncpa [#allocation4], 1 }

</bundles_post_ra>
